<compile_context>
chip_gen: v6e
topology: v6e:2x2x1
jax: 0.10.0
libtpu: 0.0.40
codegen_flags: <defaults>
</compile_context>

<pallas_src>
import jax
import jax.numpy as jnp
from jax import lax
from jax.experimental import pallas as pl
from jax.experimental.pallas import tpu as pltpu

# Fused first-layer width: actor hidden 400 in cols [0, 400), critic hidden 300
# in cols [400, 700), zero pad in [700, 768).  768 = 6 * 128 lanes.
_HA = 400
_HC = 300
_H = 768
# Head output slab width: lane 0 = mu, lane 1 = sigma, lane 2 = value, 3..7 pad.
_HEAD_W = 8
# Batch tile cap (256 matches the 2x256^2 MXU on v6e/v7x; fine on v5e too).
_TILE_B_MAX = 256


def _ac_net_kernel(x_ref, w1_ref, b1_ref, w2_ref, b2_ref, out_ref):
    # bf16 operands, f32 accumulation on the MXU.
    x = x_ref[...].astype(jnp.bfloat16)                                # (tb, D)

    # Fused first layer: [actor1 | critic1] in one MXU pass, then ReLU.
    h = jnp.dot(x, w1_ref[...], preferred_element_type=jnp.float32) + b1_ref[...]
    h = jnp.maximum(h, 0.0)                                            # (tb, 768) f32

    # Fused block-diagonal heads -> (tb, 8) slab.
    z = jnp.dot(h.astype(jnp.bfloat16), w2_ref[...],
                preferred_element_type=jnp.float32) + b2_ref[...]

    # Per-lane activation select: lane 0 -> 2*tanh, lane 1 -> softplus, else id.
    lane = lax.broadcasted_iota(jnp.int32, z.shape, dimension=1)
    mu = jnp.tanh(z) * 2.0
    sp = jnp.maximum(z, 0.0) + jnp.log1p(jnp.exp(-jnp.abs(z)))          # stable softplus
    out = jnp.where(lane == 0, mu, jnp.where(lane == 1, sp, z))

    out_ref[...] = out.astype(out_ref.dtype)                           # (tb, 8)


def _round_up(n, m):
    return ((n + m - 1) // m) * m


@jax.jit
def ac_net_forward(x, w1, b1, w2, b2):
    """x: (B, inner_dim) f32. Fused params from pack_params(). Returns (mu, sigma, value)."""
    B, D = x.shape
    tile_b = min(_TILE_B_MAX, _round_up(B, 8))
    b_pad = _round_up(B, tile_b)
    if b_pad != B:
        x = jnp.pad(x, ((0, b_pad - B), (0, 0)))
    grid = (b_pad // tile_b,)

    flops = 2 * b_pad * (D * _H + _H * _HEAD_W)
    bytes_accessed = (x.size * 4 + w1.size * 2 + b1.size * 4 +
                      w2.size * 2 + b2.size * 4 + b_pad * _HEAD_W * 4)

    slab = pl.pallas_call(
        _ac_net_kernel,
        out_shape=jax.ShapeDtypeStruct((b_pad, _HEAD_W), jnp.float32),
        grid=grid,
        in_specs=[
            pl.BlockSpec((tile_b, D), lambda i: (i, 0)),      # x: tiled over batch
            pl.BlockSpec((D, _H), lambda i: (0, 0)),          # w1: resident across steps
            pl.BlockSpec((1, _H), lambda i: (0, 0)),          # b1
            pl.BlockSpec((_H, _HEAD_W), lambda i: (0, 0)),    # w2
            pl.BlockSpec((1, _HEAD_W), lambda i: (0, 0)),     # b2
        ],
        out_specs=pl.BlockSpec((tile_b, _HEAD_W), lambda i: (i, 0)),
        compiler_params=pltpu.CompilerParams(
            dimension_semantics=("parallel",)),               # lets v7x use both TCs
        cost_estimate=pl.CostEstimate(
            flops=flops,
            transcendentals=3 * b_pad * _HEAD_W,
            bytes_accessed=bytes_accessed),
    )(x, w1, b1, w2, b2)

    head = slab[:B, :3]                                       # single slice of the slab
    return head[:, 0:1], head[:, 1:2], head[:, 2:3]


def init_params(inner_dim, key):
    """Matches the PyTorch module: normal(std=0.1) weights, zero biases.
    Weights stored as (in_features, out_features)."""
    ks = jax.random.split(key, 5)

    def w(k, shape):
        return (0.1 * jax.random.normal(k, shape)).astype(jnp.float32)

    return {
        "wa": w(ks[0], (inner_dim, 400)), "ba": jnp.zeros((1, 400), jnp.float32),
        "wmu": w(ks[1], (400, 1)),        "bmu": jnp.zeros((1, 1), jnp.float32),
        "wsg": w(ks[2], (400, 1)),        "bsg": jnp.zeros((1, 1), jnp.float32),
        "wc": w(ks[3], (inner_dim, 300)), "bc": jnp.zeros((1, 300), jnp.float32),
        "wv": w(ks[4], (300, 1)),         "bv": jnp.zeros((1, 1), jnp.float32),
    }


def pack_params(p, inner_dim):
    """Pack the 5 Linear layers into 2 fused weight/bias pairs.

    w1: (D, 768) bf16, actor cols [0,400), critic cols [400,700), pad [700,768).
    w2: (768, 8) bf16, lane 0 = mu head, lane 1 = sigma head, lane 2 = value head.
    Padded regions are exact zeros (the fusion's correctness relies on this)."""
    w1 = jnp.zeros((inner_dim, _H), jnp.float32)
    w1 = w1.at[:, :_HA].set(p["wa"])
    w1 = w1.at[:, _HA:_HA + _HC].set(p["wc"])
    b1 = jnp.zeros((1, _H), jnp.float32)
    b1 = b1.at[:, :_HA].set(p["ba"])
    b1 = b1.at[:, _HA:_HA + _HC].set(p["bc"])

    w2 = jnp.zeros((_H, _HEAD_W), jnp.float32)
    w2 = w2.at[:_HA, 0].set(p["wmu"][:, 0])
    w2 = w2.at[:_HA, 1].set(p["wsg"][:, 0])
    w2 = w2.at[_HA:_HA + _HC, 2].set(p["wv"][:, 0])
    b2 = jnp.zeros((1, _HEAD_W), jnp.float32)
    b2 = b2.at[0, 0].set(p["bmu"][0, 0])
    b2 = b2.at[0, 1].set(p["bsg"][0, 0])
    b2 = b2.at[0, 2].set(p["bv"][0, 0])
    return w1.astype(jnp.bfloat16), b1, w2.astype(jnp.bfloat16), b2


def _reference_forward(x, p):
    a1 = jax.nn.relu(x @ p["wa"] + p["ba"])
    mu = jnp.tanh(a1 @ p["wmu"] + p["bmu"]) * 2.0
    sigma = jax.nn.softplus(a1 @ p["wsg"] + p["bsg"])
    c1 = jax.nn.relu(x @ p["wc"] + p["bc"])
    value = c1 @ p["wv"] + p["bv"]
    return mu, sigma, value


if __name__ == "__main__":
    key = jax.random.PRNGKey(0)
    k_x, k_p = jax.random.split(key)

    batch, inner_dim = 8, 32
    x = jax.random.normal(k_x, (batch, inner_dim), dtype=jnp.float32)
    params = init_params(inner_dim, k_p)
    w1, b1, w2, b2 = pack_params(params, inner_dim)

    mu, sigma, value = ac_net_forward(x, w1, b1, w2, b2)
    jax.block_until_ready((mu, sigma, value))

    # Sanity check against a pure-JAX f32 reference of the unfused module.
    # Tolerance re-validated for bf16 weights (MXU bf16 path): worst-case
    # head error is ~1e-2 absolute at these weight scales.
    mu_r, sigma_r, value_r = _reference_forward(x, params)
    assert mu.shape == (batch, 1) and sigma.shape == (batch, 1) and value.shape == (batch, 1)
    assert jnp.allclose(mu, mu_r, atol=2e-2, rtol=2e-2)
    assert jnp.allclose(sigma, sigma_r, atol=2e-2, rtol=2e-2)
    assert jnp.allclose(value, value_r, atol=2e-2, rtol=2e-2)

    print("KERNEL_OK")
</pallas_src>

<mosaic_0001>
module attributes {stable_mosaic.version = 11 : i64} {
  func.func @_ac_net_kernel(%arg0: i32, %arg1: memref<8x32xf32, #tpu.memory_space<vmem>>, %arg2: memref<32x768xbf16, #tpu.memory_space<vmem>>, %arg3: memref<1x768xf32, #tpu.memory_space<vmem>>, %arg4: memref<768x8xbf16, #tpu.memory_space<vmem>>, %arg5: memref<1x8xf32, #tpu.memory_space<vmem>>, %arg6: memref<8x8xf32, #tpu.memory_space<vmem>>) attributes {dimension_semantics = [#tpu.dimension_semantics<parallel>], iteration_bounds = array<i64: 1>, scalar_prefetch = 0 : i64, scratch_operands = 0 : i64, tpu.core_type = #tpu.core_type<tc>, window_params = [{transform_indices = @transform_0, window_bounds = array<i64: 8, 32>}, {pipeline_mode = #tpu.pipeline_mode<synchronous>, transform_indices = @transform_1, window_bounds = array<i64: 32, 768>}, {pipeline_mode = #tpu.pipeline_mode<synchronous>, transform_indices = @transform_2, window_bounds = array<i64: 1, 768>}, {pipeline_mode = #tpu.pipeline_mode<synchronous>, transform_indices = @transform_3, window_bounds = array<i64: 768, 8>}, {pipeline_mode = #tpu.pipeline_mode<synchronous>, transform_indices = @transform_4, window_bounds = array<i64: 1, 8>}, {transform_indices = @transform_5, window_bounds = array<i64: 8, 8>}]} {
    %c0 = arith.constant 0 : index
    %c0_0 = arith.constant 0 : index
    %0 = vector.load %arg1[%c0, %c0_0] : memref<8x32xf32, #tpu.memory_space<vmem>>, vector<8x32xf32>
    %1 = arith.truncf %0 : vector<8x32xf32> to vector<8x32xbf16>
    %c0_1 = arith.constant 0 : index
    %c0_2 = arith.constant 0 : index
    %2 = vector.load %arg2[%c0_1, %c0_2] : memref<32x768xbf16, #tpu.memory_space<vmem>>, vector<32x768xbf16>
    %cst = arith.constant dense<0.000000e+00> : vector<8x768xf32>
    %3 = tpu.matmul %1, %2, %cst {dimension_numbers = #tpu.dot_dimension_numbers<[1], [0], [0], [1], [0, 0, 1, 1], [], []>} : vector<8x32xbf16>, vector<32x768xbf16>, vector<8x768xf32> -> vector<8x768xf32>
    %c0_3 = arith.constant 0 : index
    %c0_4 = arith.constant 0 : index
    %4 = vector.load %arg3[%c0_3, %c0_4] : memref<1x768xf32, #tpu.memory_space<vmem>>, vector<1x768xf32>
    %5 = vector.broadcast %4 : vector<1x768xf32> to vector<8x768xf32>
    %6 = arith.addf %3, %5 : vector<8x768xf32>
    %cst_5 = arith.constant 0.000000e+00 : f32
    %7 = vector.broadcast %cst_5 : f32 to vector<8x768xf32>
    %8 = arith.maximumf %6, %7 : vector<8x768xf32>
    %9 = arith.truncf %8 : vector<8x768xf32> to vector<8x768xbf16>
    %c0_6 = arith.constant 0 : index
    %c0_7 = arith.constant 0 : index
    %10 = vector.load %arg4[%c0_6, %c0_7] : memref<768x8xbf16, #tpu.memory_space<vmem>>, vector<768x8xbf16>
    %cst_8 = arith.constant dense<0.000000e+00> : vector<8x8xf32>
    %11 = tpu.matmul %9, %10, %cst_8 {dimension_numbers = #tpu.dot_dimension_numbers<[1], [0], [0], [1], [0, 0, 1, 1], [], []>} : vector<8x768xbf16>, vector<768x8xbf16>, vector<8x8xf32> -> vector<8x8xf32>
    %c0_9 = arith.constant 0 : index
    %c0_10 = arith.constant 0 : index
    %12 = vector.load %arg5[%c0_9, %c0_10] : memref<1x8xf32, #tpu.memory_space<vmem>>, vector<1x8xf32>
    %13 = vector.broadcast %12 : vector<1x8xf32> to vector<8x8xf32>
    %14 = arith.addf %11, %13 : vector<8x8xf32>
    %15 = tpu.iota {dimensions = array<i32: 1>} : vector<8x8xi32>
    %16 = math.tanh %14 : vector<8x8xf32>
    %cst_11 = arith.constant 2.000000e+00 : f32
    %17 = vector.broadcast %cst_11 : f32 to vector<8x8xf32>
    %18 = arith.mulf %16, %17 : vector<8x8xf32>
    %cst_12 = arith.constant 0.000000e+00 : f32
    %19 = vector.broadcast %cst_12 : f32 to vector<8x8xf32>
    %20 = arith.maximumf %14, %19 : vector<8x8xf32>
    %21 = math.absf %14 : vector<8x8xf32>
    %cst_13 = arith.constant 0.000000e+00 : f32
    %22 = vector.broadcast %cst_13 : f32 to vector<8x8xf32>
    %23 = arith.subf %22, %21 : vector<8x8xf32>
    %24 = math.exp %23 : vector<8x8xf32>
    %25 = math.log1p %24 : vector<8x8xf32>
    %26 = arith.addf %20, %25 : vector<8x8xf32>
    %c0_i32 = arith.constant 0 : i32
    %27 = vector.broadcast %c0_i32 : i32 to vector<8x8xi32>
    %28 = arith.cmpi eq, %15, %27 : vector<8x8xi32>
    %c1_i32 = arith.constant 1 : i32
    %29 = vector.broadcast %c1_i32 : i32 to vector<8x8xi32>
    %30 = arith.cmpi eq, %15, %29 : vector<8x8xi32>
    %31 = arith.select %30, %26, %14 : vector<8x8xi1>, vector<8x8xf32>
    %32 = arith.select %28, %18, %31 : vector<8x8xi1>, vector<8x8xf32>
    %c0_14 = arith.constant 0 : index
    %c0_15 = arith.constant 0 : index
    %33 = vector.load %arg6[%c0_14, %c0_15] : memref<8x8xf32, #tpu.memory_space<vmem>>, vector<8x8xf32>
    tpu.vector_store %arg6[%c0_14, %c0_15], %32 {strides = array<i32>} : memref<8x8xf32, #tpu.memory_space<vmem>>, vector<8x8xf32>,
    return
  }
  func.func @transform_0(%arg0: i32) -> (i32, i32) {
    %c0_i32 = arith.constant 0 : i32
    %c0_i32_0 = arith.constant 0 : i32
    return %arg0, %c0_i32 : i32, i32
  }
  func.func @transform_1(%arg0: i32) -> (i32, i32) {
    %c0_i32 = arith.constant 0 : i32
    %c0_i32_0 = arith.constant 0 : i32
    %c0_i32_1 = arith.constant 0 : i32
    return %c0_i32, %c0_i32_0 : i32, i32
  }
  func.func @transform_2(%arg0: i32) -> (i32, i32) {
    %c0_i32 = arith.constant 0 : i32
    %c0_i32_0 = arith.constant 0 : i32
    %c0_i32_1 = arith.constant 0 : i32
    return %c0_i32, %c0_i32_0 : i32, i32
  }
  func.func @transform_3(%arg0: i32) -> (i32, i32) {
    %c0_i32 = arith.constant 0 : i32
    %c0_i32_0 = arith.constant 0 : i32
    %c0_i32_1 = arith.constant 0 : i32
    return %c0_i32, %c0_i32_0 : i32, i32
  }
  func.func @transform_4(%arg0: i32) -> (i32, i32) {
    %c0_i32 = arith.constant 0 : i32
    %c0_i32_0 = arith.constant 0 : i32
    %c0_i32_1 = arith.constant 0 : i32
    return %c0_i32, %c0_i32_0 : i32, i32
  }
  func.func @transform_5(%arg0: i32) -> (i32, i32) {
    %c0_i32 = arith.constant 0 : i32
    %c0_i32_0 = arith.constant 0 : i32
    return %arg0, %c0_i32 : i32, i32
  }
}

</mosaic_0001>

<bundles_post_ra>
// kernel: ac_net_forward.1
= control target key start
LH: loop header
LB: loop body
LE: loop exit
PB: predicated region body
PF: predicated region fallthrough
CT: control target
= control target key end

     0   :  { %v1009_v1 = vmov 0   ;;  %vm127_vm0 = vcmask 261120   ;;  %v37_v48 = vlaneseq  ;;  %vm800_vm4 = vcmask 64512   ;;  %s1253_s1 = inlined_call_operand.vmem [shape: bf16[32,768], index: 1, kind: input, shape index: {}]   ;;  %s1254_s0 = inlined_call_operand.vmem [shape: f32[8,32], index: 0, kind: input, shape index: {}]   ;;  %s1255_s3 = inlined_call_operand.vmem [shape: bf16[768,8], index: 3, kind: input, shape index: {}]   ;;  %s1256_s2 = inlined_call_operand.vmem [shape: f32[1,768], index: 2, kind: input, shape index: {}]   ;;  %s1257_s4 = inlined_call_operand.vmem [shape: f32[1,8], index: 4, kind: input, shape index: {}]   ;;  %s1258_s5 = inlined_call_operand.vmem [shape: f32[8,8], index: 5, kind: output, shape index: {}]  }
   0x1   :  { %v937_v0 = vld [vmem:[%s1253_s1 + $0x34] ss:$24 sps:$4 sm:$0xff]   ;;  %163 = vmatprep.mubr.bf16.mxu0 %v1009_v1  ;;  %v939_v2 = vld [vmem:[%s1253_s1 + $0x30] ss:$24 sps:$4 sm:$0xff]   ;;  %v940_v3 = vld [vmem:[%s1253_s1 + $0x4] ss:$24 sps:$4 sm:$0xff]  }
   0x2   :  { %143 = vmatprep.subr.bf16.mxu0 %v937_v0  ;;  %v942_v4 = vld [vmem:[%s1253_s1] ss:$24 sps:$4 sm:$0xff]   ;;  %v945_v6 = vld [vmem:[%s1253_s1 + $0x3c] ss:$24 sps:$4 sm:$0xff]   ;;  %v948_v9 = vld [vmem:[%s1253_s1 + $0xc] ss:$24 sps:$4 sm:$0xff]  }
   0x3   :  { %144 = vmatpush1.bf16.msra.mxu0 %v939_v2  ;;  %v21_v5 = vld [vmem:[%s1254_s0] sm:$0xff]  ;;  %v943_v8 = vld [vmem:[%s1253_s1 + $0x38] ss:$24 sps:$4 sm:$0xff]   ;;  %v959_v16 = vld [vmem:[%s1255_s3 + $0x68] sm:$0xff]   ;;  %v1182_v49 = vshrl.u32 %v37_v48, 7 }
   0x4   :  { %145 = vmatprep.subr.bf16.mxu0 %v940_v3  ;;  %v22_v7 = vpack.c.bf16 %v21_v5, %v21_v5  ;;  %v946_v10 = vld [vmem:[%s1253_s1 + $0x8] ss:$24 sps:$4 sm:$0xff]   ;;  %v955_v11 = vld [vmem:[%s1255_s3 + $0x78] sm:$0xff]   ;;  %v957_v13 = vld [vmem:[%s1255_s3 + $0x70] sm:$0xff]  }
   0x5   :  { %v956_v12 = vld [vmem:[%s1255_s3 + $0x38] sm:$0xff]   ;;  %870 = vmatprep.subr.bf16.mxu1 %v955_v11  ;;  %v958_v15 = vld [vmem:[%s1255_s3 + $0x30] sm:$0xff]   ;;  %v960_v19 = vld [vmem:[%s1255_s3 + $0x28] sm:$0xff]   ;;  %v39_v50 = vsub.s32 0, %v1182_v49  ;;  %v43_v52 = vsub.s32 1, %v1182_v49  ;;  %v47_v57 = vsub.s32 2, %v1182_v49 }
   0x6   :  { %v951_v14 = vld [vmem:[%s1253_s1 + $0x44] ss:$24 sps:$4 sm:$0xff]   ;;  %871 = vmatpush3.bf16.msra.mxu1 %v956_v12  ;;  %v949_v17 = vld [vmem:[%s1253_s1 + $0x40] ss:$24 sps:$4 sm:$0xff]   ;;  %v954_v18 = vld [vmem:[%s1253_s1 + $0x14] ss:$24 sps:$4 sm:$0xff]  }
   0x7   :  { %146 = vmatpush1.bf16.msra.mxu0 %v942_v4  ;;  %872 = vmatprep.subr.bf16.mxu1 %v957_v13  ;;  %v963_v20 = vld [vmem:[%s1255_s3 + $0x60] sm:$0xff]   ;;  %v952_v21 = vld [vmem:[%s1253_s1 + $0x10] ss:$24 sps:$4 sm:$0xff]   ;;  %v961_v22 = vld [vmem:[%s1255_s3 + $0xf8] sm:$0xff]   ;;  %v51_v60 = vsub.s32 3, %v1182_v49  ;;  %v59_v13 = vsub.s32 5, %v1182_v49 }
   0x8   :  { %184 = vmatprep.subr.bf16.mxu0 %v945_v6  ;;  %v964_v23 = vld [vmem:[%s1255_s3 + $0x20] sm:$0xff]   ;;  %v967_v24 = vld [vmem:[%s1255_s3 + $0x58] sm:$0xff]   ;;  %v965_v26 = vld [vmem:[%s1255_s3 + $0xf0] sm:$0xff]  }
   0x9   :  { %v962_v25 = vld [vmem:[%s1255_s3 + $0xb8] sm:$0xff]   ;;  %v971_v28 = vld [vmem:[%s1255_s3 + $0x50] sm:$0xff]   ;;  %v969_v30 = vld [vmem:[%s1255_s3 + $0xe8] sm:$0xff]  }
   0xa   :  { %818 = vmatmul.mubr.msk.bf16.vlgmr.msra.gmra.mxu0 %vm127_vm0, %v22_v7  ;;  %873 = vmatpush3.bf16.msra.mxu1 %v958_v15  ;;  %v968_v27 = vld [vmem:[%s1255_s3 + $0x18] sm:$0xff]   ;;  %v966_v29 = vld [vmem:[%s1255_s3 + $0xb0] sm:$0xff]   ;;  %v970_v32 = vld [vmem:[%s1255_s3 + $0xa8] sm:$0xff]  }
   0xb   :  { %185 = vmatpush1.bf16.msra.mxu0 %v943_v8  ;;  %204 = vmatprep.mubr.bf16.mxu0 %v1009_v1  ;;  %v972_v31 = vld [vmem:[%s1255_s3 + $0x10] sm:$0xff]   ;;  %v973_v33 = vld [vmem:[%s1255_s3 + $0xe0] sm:$0xff]   ;;  %v975_v35 = vld [vmem:[%s1255_s3 + $0x48] sm:$0xff]  }
   0xc   :  { %186 = vmatprep.subr.bf16.mxu0 %v948_v9  ;;  %874 = vmatprep.subr.bf16.mxu1 %v959_v16  ;;  %v974_v34 = vld [vmem:[%s1255_s3 + $0xa0] sm:$0xff]   ;;  %v976_v36 = vld [vmem:[%s1255_s3 + $0x8] sm:$0xff]   ;;  %v977_v37 = vld [vmem:[%s1255_s3 + $0xd8] sm:$0xff]  }
   0xd   :  { %v978_v38 = vld [vmem:[%s1255_s3 + $0x98] sm:$0xff]   ;;  %v979_v39 = vld [vmem:[%s1255_s3 + $0x40] sm:$0xff]   ;;  %v981_v41 = vld [vmem:[%s1255_s3 + $0xd0] sm:$0xff]  }
   0xe   :  { %875 = vmatpush3.bf16.msra.mxu1 %v960_v19  ;;  %v980_v40 = vld [vmem:[%s1255_s3] sm:$0xff]   ;;  %v982_v42 = vld [vmem:[%s1255_s3 + $0x90] sm:$0xff]   ;;  %v983_v43 = vld [vmem:[%s1255_s3 + $0x178] sm:$0xff]  }
   0xf   :  { %187 = vmatpush1.bf16.msra.mxu0 %v946_v10  ;;  %876 = vmatprep.subr.bf16.mxu1 %v963_v20  ;;  %v984_v44 = vld [vmem:[%s1255_s3 + $0xc8] sm:$0xff]   ;;  %v988_v46 = vld [vmem:[%s1255_s3 + $0xc0] sm:$0xff]   ;;  %v985_v4 = vld [vmem:[%s1255_s3 + $0x138] sm:$0xff]  }
  0x10   :  { %225 = vmatprep.subr.bf16.mxu0 %v951_v14  ;;  %v986_v45 = vld [vmem:[%s1255_s3 + $0x88] sm:$0xff]   ;;  %v990_v47 = vld [vmem:[%s1255_s3 + $0x80] sm:$0xff]   ;;  %v989_v12 = vld [vmem:[%s1255_s3 + $0x130] sm:$0xff]  }
  0x11   :  { %v1188_v51 = vld [vmem:[%s1256_s2] sm:$0x3f]  ;;  %v991_v14 = vld [vmem:[%s1255_s3 + $0x168] sm:$0xff]  }
  0x12   :  { %819 = vmatmul.mubr.msk.bf16.vlgmr.msra.gmra.mxu0 %vm127_vm0, %v22_v7  ;;  %877 = vmatpush3.bf16.msra.mxu1 %v964_v23  ;;  %v40_v53 = vrot.slane %v1188_v51, %v39_v50  ;;  %v44_v54 = vrot.slane %v1188_v51, %v43_v52  ;;  %v48_v63 = vrot.slane %v1188_v51, %v47_v57  ;;  %v992_v20 = vld [vmem:[%s1255_s3 + $0x128] sm:$0xff]  }
  0x13   :  { %226 = vmatpush1.bf16.msra.mxu0 %v949_v17  ;;  %245 = vmatprep.mubr.bf16.mxu0 %v1009_v1  ;;  %v52_v3 = vrot.slane %v1188_v51, %v51_v60 }
  0x14   :  { %227 = vmatprep.subr.bf16.mxu0 %v954_v18  ;;  %878 = vmatprep.subr.bf16.mxu1 %v967_v24 }
  0x16   :  { %879 = vmatpush3.bf16.msra.mxu1 %v968_v27  ;;  %v995_v27 = vld [vmem:[%s1255_s3 + $0x158] sm:$0xff]  }
  0x17   :  { %228 = vmatpush1.bf16.msra.mxu0 %v952_v21  ;;  %880 = vmatprep.subr.bf16.mxu1 %v971_v28  ;;  %v60_v21 = vrot.slane %v1188_v51, %v59_v13 }
  0x18   :  { %892 = vmatprep.subr.bf16.mxu0 %v961_v22  ;;  %v993_v22 = vld [vmem:[%s1255_s3 + $0x160] sm:$0xff]  }
  0x1a   :  { %820 = vmatmul.mubr.msk.bf16.vlgmr.msra.gmra.mxu0 %vm127_vm0, %v22_v7  ;;  %881 = vmatpush3.bf16.msra.mxu1 %v972_v31  ;;  %v987_v7 = vld [vmem:[%s1255_s3 + $0x170] sm:$0xff]   ;;  %v996_v31 = vld [vmem:[%s1255_s3 + $0x118] sm:$0xff]  }
  0x1b   :  { %893 = vmatpush3.bf16.msra.mxu0 %v962_v25  ;;  %882 = vmatprep.subr.bf16.mxu1 %v975_v35  ;;  %v994_v25 = vld [vmem:[%s1255_s3 + $0x120] sm:$0xff]   ;;  %v998_v35 = vld [vmem:[%s1255_s3 + $0x110] sm:$0xff]  }
  0x1c   :  { %894 = vmatprep.subr.bf16.mxu0 %v965_v26 }
  0x1e   :  { %883 = vmatpush3.bf16.msra.mxu1 %v976_v36 }
  0x1f   :  { %895 = vmatpush3.bf16.msra.mxu0 %v966_v29  ;;  %884 = vmatprep.subr.bf16.mxu1 %v979_v39 }
  0x20   :  { %896 = vmatprep.subr.bf16.mxu0 %v969_v30 }
  0x22   :  { %885 = vmatpush3.bf16.msra.mxu1 %v980_v40  ;;  %v1001_v40 = vld [vmem:[%s1255_s3 + $0x140] sm:$0xff]  }
  0x23   :  { %897 = vmatpush3.bf16.msra.mxu0 %v970_v32  ;;  %914 = vmatprep.subr.bf16.mxu1 %v983_v43 }
  0x24   :  { %898 = vmatprep.subr.bf16.mxu0 %v973_v33  ;;  %v55_v33 = vsub.s32 4, %v1182_v49 }
  0x26   :  { %v56_v36 = vrot.slane %v1188_v51, %v55_v33 }
  0x27   :  { %899 = vmatpush3.bf16.msra.mxu0 %v974_v34  ;;  %v997_v34 = vld [vmem:[%s1255_s3 + $0x150] sm:$0xff]  }
  0x28   :  { %900 = vmatprep.subr.bf16.mxu0 %v977_v37  ;;  %v999_v37 = vld [vmem:[%s1255_s3 + $0x148] sm:$0xff]  }
  0x2b   :  { %901 = vmatpush3.bf16.msra.mxu0 %v978_v38  ;;  %v1000_v38 = vld [vmem:[%s1255_s3 + $0x108] sm:$0xff]  }
  0x2c   :  { %902 = vmatprep.subr.bf16.mxu0 %v981_v41  ;;  %v1002_v41 = vld [vmem:[%s1255_s3 + $0x100] sm:$0xff]  }
  0x2f   :  { %903 = vmatpush3.bf16.msra.mxu0 %v982_v42 }
  0x30   :  { %904 = vmatprep.subr.bf16.mxu0 %v984_v44 }
  0x33   :  { %905 = vmatpush3.bf16.msra.mxu0 %v986_v45 }
  0x34   :  { %906 = vmatprep.subr.bf16.mxu0 %v988_v46 }
  0x37   :  { %907 = vmatpush3.bf16.msra.mxu0 %v990_v47 }
  0xca   :  { %v165_v55 = vpop.f32.mrf.mxu0 }
  0xcb   :  { %v166_v56 = vadd.f32 %v165_v55, %v40_v53 }
  0xcc   :  { %v167_v58 = vpop.f32.mrf.mxu0 }
  0xcd   :  { %v168_v59 = vadd.f32 %v167_v58, %v44_v54  ;;  %v254_v61 = vmax.f32 %v166_v56, 0.0  ;;  %v821_v54 = vld [vmem:[%s1257_s4] ss:$0 sm:$0xff] }
  0xce   :  { %v169_v62 = vpop.f32.mrf.mxu0 }
  0xcf   :  { %v255_v0 = vmax.f32 %v168_v59, 0.0  ;;  %v260_v5 = vpack.c.bf16 %v254_v61, %v254_v61 }
  0xd0   :  { %v170_v1 = vpop.f32.mrf.mxu0 }
  0xd1   :  { %v261_v2 = vpack.c.bf16 %v255_v0, %v255_v0 }
  0xd2   :  { %v206_v6 = vpop.f32.mrf.mxu0 }
  0xd3   :  { %v207_v8 = vadd.f32 %v206_v6, %v48_v63  ;;  %689 = vmatprep.mubr.bf16.mxu1 %v261_v2 }
  0xd4   :  { %v208_v9 = vpop.f32.mrf.mxu0  ;;  %690 = vmatmul.mubr.bf16.vlgmr.msra.gmra.mxu1 %v260_v5 }
  0xd5   :  { %v256_v10 = vmax.f32 %v207_v8, 0.0  ;;  %v209_v11 = vadd.f32 %v208_v9, %v52_v3  ;;  %915 = vmatpush3.bf16.msra.mxu1 %v985_v4  ;;  %v778_v8 = vand.u32 127, %v37_v48 }
  0xd6   :  { %916 = vmatprep.subr.bf16.mxu1 %v987_v7  ;;  %v210_v15 = vpop.f32.mrf.mxu0 }
  0xd7   :  { %v257_v16 = vmax.f32 %v209_v11, 0.0  ;;  %v262_v17 = vpack.c.bf16 %v256_v10, %v256_v10  ;;  %vm797_vm2 = vcmp.eq.s32.totalorder %v778_v8, 1  ;;  %vm796_vm3 = vcmp.eq.s32.totalorder %v778_v8, 0 }
  0xd8   :  { %v211_v18 = vpop.f32.mrf.mxu0 }
  0xd9   :  { %v263_v19 = vpack.c.bf16 %v257_v16, %v257_v16  ;;  %917 = vmatpush3.bf16.msra.mxu1 %v989_v12 }
  0xda   :  { %918 = vmatprep.subr.bf16.mxu1 %v991_v14  ;;  %v247_v23 = vpop.f32.mrf.mxu0 }
  0xdb   :  { %729 = vmatprep.mubr.bf16.mxu0 %v263_v19  ;;  %v248_v39 = vadd.f32 %v247_v23, %v56_v36 }
  0xdc   :  { %730 = vmatmul.mubr.bf16.vlgmr.msra.gmra.mxu0 %v262_v17  ;;  %v249_v24 = vpop.f32.mrf.mxu0 }
  0xdd   :  { %919 = vmatpush3.bf16.msra.mxu1 %v992_v20  ;;  %v250_v26 = vadd.f32 %v249_v24, %v60_v21  ;;  %v258_v42 = vmax.f32 %v248_v39, 0.0 }
  0xde   :  { %920 = vmatprep.subr.bf16.mxu1 %v993_v22  ;;  %v251_v28 = vpop.f32.mrf.mxu0 }
  0xdf   :  { %v259_v29 = vmax.f32 %v250_v26, 0.0  ;;  %v264_v43 = vpack.c.bf16 %v258_v42, %v258_v42 }
  0xe0   :  { %v252_v30 = vpop.f32.mrf.mxu0 }
  0xe1   :  { %921 = vmatpush3.bf16.msra.mxu1 %v994_v25  ;;  %v265_v32 = vpack.c.bf16 %v259_v29, %v259_v29 }
  0xe2   :  { %922 = vmatprep.subr.bf16.mxu1 %v995_v27 }
  0xe3   :  { %769 = vmatprep.mubr.bf16.mxu1 %v265_v32 }
  0xe5   :  { %923 = vmatpush3.bf16.msra.mxu1 %v996_v31 }
  0xe6   :  { %924 = vmatprep.subr.bf16.mxu1 %v997_v34 }
  0xe9   :  { %925 = vmatpush3.bf16.msra.mxu1 %v998_v35 }
  0xea   :  { %926 = vmatprep.subr.bf16.mxu1 %v999_v37 }
  0xed   :  { %927 = vmatpush3.bf16.msra.mxu1 %v1000_v38 }
  0xee   :  { %928 = vmatprep.subr.bf16.mxu1 %v1001_v40 }
  0xf1   :  { %929 = vmatpush3.bf16.msra.mxu1 %v1002_v41 }
  0xf4   :  { %770 = vmatmul.mubr.bf16.vlgmr.msra.gmra.mxu1 %v264_v43 }
 0x194   :  { %v886_v44 = vpop.f32.mrf.mxu1 }
 0x196   :  { %v887_v45 = vpop.f32.mrf.mxu1 }
 0x197   :  { %v888_v53 = vadd.f32 %v887_v45, %v886_v44 }
 0x198   :  { %v889_v46 = vpop.f32.mrf.mxu1 }
 0x199   :  { %v692_v57 = vadd.f32 %v888_v53, %v821_v54 }
 0x19a   :  { %v890_v47 = vpop.f32.mrf.mxu1 }
 0x19c   :  { %v908_v49 = vpop.f32.mrf.mxu0 }
 0x19e   :  { %v909_v50 = vpop.f32.mrf.mxu0 }
 0x19f   :  { %v910_v55 = vadd.f32 %v909_v50, %v908_v49 }
 0x1a0   :  { %v911_v51 = vpop.f32.mrf.mxu0 }
 0x1a1   :  { %v732_v59 = vadd.f32 %v910_v55, %v692_v57 }
 0x1a2   :  { %v912_v52 = vpop.f32.mrf.mxu0 }
 0x1b4   :  { %v930_v56 = vpop.f32.mrf.mxu1 }
 0x1b6   :  { %v931_v58 = vpop.f32.mrf.mxu1 }
 0x1b7   :  { %v932_v60 = vadd.f32 %v931_v58, %v930_v56 }
 0x1b8   :  { %v933_v61 = vpop.f32.mrf.mxu1 }
 0x1b9   :  { %v772_v62 = vadd.f32 %v932_v60, %v732_v59 }
 0x1ba   :  { %v934_v63 = vpop.f32.mrf.mxu1 }
 0x1bb   :  { %v782_v0 = vand.u32 2147483647, %v772_v62  ;;  %v781_v13 = vmax.f32 %v772_v62, 0.0 }
 0x1bd   :  { %v783_v1 = vsub.f32 0.0, %v782_v0 }
 0x1bf   :  { %v784_v2 = vmul.f32 1.442695, %v783_v1 }
 0x1c1   :  { %1003 = vpow2.f32 %v784_v2 }
 0x1ce   :  { %v1004_v3 = vpop.eup %1003 }
 0x1cf   :  { %v786_v4 = vadd.f32 1.0, %v1004_v3  ;;  %v789_v5 = vmul.f32 -0.5, %v1004_v3  ;;  %v792_v7 = vand.u32 2147483647, %v1004_v3 }
 0x1d1   :  { %1005 = vlog2.f32 %v786_v4  ;;  %v790_v6 = vadd.f32 1.0, %v789_v5  ;;  %vm793_vm1 = vcmp.lt.f32.partialorder %v792_v7, 0.0004427343 }
 0x1d2   :  { %1007 = vtanh.f32 %v772_v62 }
 0x1d3   :  { %v791_v11 = vmul.f32 %v1004_v3, %v790_v6 }
 0x1de   :  { %v1006_v9 = vpop.eup %1005 }
 0x1df   :  { %v788_v10 = vmul.f32 0.6931472, %v1006_v9  ;;  %v1008_v12 = vpop.eup %1007 }
 0x1e0   :  { %v780_v16 = vmul.f32 2.0, %v1008_v12 }
 0x1e1   :  { %v794_v14 = vsel %vm793_vm1, %v791_v11, %v788_v10 }
 0x1e2   :  { %v795_v15 = vadd.f32 %v794_v14, %v781_v13 }
 0x1e4   :  { %v798_v17 = vsel %vm797_vm2, %v795_v15, %v772_v62 }
 0x1e5   :  { %v799_v18 = vsel %vm796_vm3, %v780_v16, %v798_v17 }
 0x1e6   :  { %801 = vst.msk [vmem:[%s1258_s5] sm:$0xff] %vm800_vm4, %v799_v18 }

</bundles_post_ra>
